<compile_context>
chip_gen: v7x
topology: tpu7x:2x2x1
jax: 0.10.0
libtpu: 0.0.40
codegen_flags: <defaults>
</compile_context>

<pallas_src>
import jax
import jax.numpy as jnp
from jax.experimental import pallas as pl
from jax.experimental.pallas import tpu as pltpu


def _cls_kernel(x_ref, w_ref, b_ref, o_ref, acc_ref):
    # x_ref: (TB, TS, H), w_ref: (H, Cp), b_ref: (1, Cp), o_ref: (TB, Cp)
    # acc_ref: (TB, H) f32 running-max accumulator (persists across the S grid axis).
    s = pl.program_id(1)

    @pl.when(s == 0)
    def _init():
        acc_ref[...] = jnp.full_like(acc_ref, -jnp.inf)

    # Per-tile max over the sequence slab, then elementwise running max on the VPU.
    tile_max = jnp.max(x_ref[...].astype(jnp.float32), axis=1)      # (TB, H)
    acc_ref[...] = jnp.maximum(acc_ref[...], tile_max)

    @pl.when(s == pl.num_programs(1) - 1)
    def _finalize():
        pooled = acc_ref[...]                                        # (TB, H)
        out = jnp.dot(pooled, w_ref[...],
                      preferred_element_type=jnp.float32)            # (TB, Cp) on MXU
        o_ref[...] = (out + b_ref[...]).astype(o_ref.dtype)


def _pick_tile(dim: int, target: int, align: int) -> int:
    """Largest divisor of `dim` that is <= target and is either == dim or a multiple of `align`."""
    if dim <= target:
        return dim
    for t in range(min(target, dim), 0, -1):
        if dim % t == 0 and t % align == 0:
            return t
    return dim  # fall back to the full dimension (always a legal block)


def multiclass_classification(x, w, b, mask=None, *, tb=None, ts=None,
                              target_tile_bytes=4 * 1024 * 1024):
    """x: (B, S, H) f32, w: (H, C) f32, b: (C,) f32 -> (B, C) f32. `mask` is unused
    (matches the reference forward)."""
    del mask
    B, S, H = x.shape
    Hw, C = w.shape
    assert Hw == H

    # Lane-dense output: pad num_classes up to a multiple of 128 (zero-padded columns,
    # sliced off after the kernel). w is tiny and resident, so this is essentially free.
    Cp = ((C + 127) // 128) * 128
    if Cp != C:
        w_p = jnp.pad(w, ((0, 0), (0, Cp - C)))
        b_p = jnp.pad(b, (0, Cp - C))
    else:
        w_p, b_p = w, b
    w_p = w_p.astype(jnp.float32)
    b2 = b_p.reshape(1, Cp).astype(jnp.float32)

    # Tile sizes. TB over batch (parallel), TS over sequence (reduction). Keep the x
    # tile a few MiB so 2x double-buffered tiles + accumulator fit v7x's 64 MiB VMEM.
    TB = tb if tb is not None else _pick_tile(B, 128, 8)
    if ts is not None:
        TS = ts
    else:
        ts_budget = max(8, target_tile_bytes // max(1, TB * H * 4))
        TS = _pick_tile(S, min(512, ts_budget), 8)
    assert B % TB == 0 and S % TS == 0

    grid = (B // TB, S // TS)

    itemsize = jnp.dtype(x.dtype).itemsize
    cost = pl.CostEstimate(
        flops=int(2 * B * H * Cp),
        transcendentals=0,
        bytes_accessed=int(B * S * H * itemsize + H * Cp * 4 + Cp * 4 + B * Cp * 4),
    )

    out = pl.pallas_call(
        _cls_kernel,
        out_shape=jax.ShapeDtypeStruct((B, Cp), jnp.float32),
        grid_spec=pltpu.PrefetchScalarGridSpec(
            num_scalar_prefetch=0,
            grid=grid,
            in_specs=[
                pl.BlockSpec((TB, TS, H), lambda i, s: (i, s, 0)),   # streamed x tiles
                pl.BlockSpec((H, Cp), lambda i, s: (0, 0)),          # resident weights
                pl.BlockSpec((1, Cp), lambda i, s: (0, 0)),          # resident bias
            ],
            out_specs=pl.BlockSpec((TB, Cp), lambda i, s: (i, 0)),   # written on last S step
            scratch_shapes=[pltpu.VMEM((TB, H), jnp.float32)],       # running-max accumulator
        ),
        compiler_params=pltpu.CompilerParams(
            dimension_semantics=("parallel", "arbitrary"),
            vmem_limit_bytes=48 * 1024 * 1024,
        ),
        cost_estimate=cost,
    )(x, w_p, b2)

    # TODO(synk): PyTorch's .squeeze() also drops the batch dim when B == 1; we always
    # return (B, C), which is the sane batched behavior.
    return out[:, :C]


if __name__ == "__main__":
    # Small shapes consistent with the module: batch=4, seq_len=16, hidden=32, num_classes=8.
    B, S, H, C = 4, 16, 32, 8

    key = jax.random.PRNGKey(0)
    kx, kw, kb, km = jax.random.split(key, 4)

    x = jax.random.normal(kx, (B, S, H), dtype=jnp.float32)
    mask = jax.random.bernoulli(km, 0.5, (B, S)).astype(jnp.float32)  # unused by forward

    # Deterministic "Linear(hidden, num_classes)" params (synthetic init).
    w = jax.random.normal(kw, (H, C), dtype=jnp.float32) * (1.0 / jnp.sqrt(H))
    b = jax.random.normal(kb, (C,), dtype=jnp.float32) * 0.01

    # ts=8 forces two sequence-reduction grid steps, exercising the -inf init /
    # running-max / finalize path even at these small shapes.
    out = multiclass_classification(x, w, b, mask, ts=8)
    out = jax.block_until_ready(out)

    # Pure-JAX reference check.
    ref = jnp.max(x, axis=1) @ w + b
    assert out.shape == (B, C)
    assert jnp.allclose(out, ref, atol=1e-5, rtol=1e-5)

    print("KERNEL_OK")
</pallas_src>

<mosaic_0001>
module attributes {stable_mosaic.version = 11 : i64} {
  func.func @_cls_kernel(%arg0: i32, %arg1: i32, %arg2: memref<4x8x32xf32, #tpu.memory_space<vmem>>, %arg3: memref<32x128xf32, #tpu.memory_space<vmem>>, %arg4: memref<1x128xf32, #tpu.memory_space<vmem>>, %arg5: memref<4x128xf32, #tpu.memory_space<vmem>>, %arg6: memref<4x32xf32, #tpu.memory_space<vmem>>) attributes {dimension_semantics = [#tpu.dimension_semantics<parallel>, #tpu.dimension_semantics<arbitrary>], iteration_bounds = array<i64: 1, 2>, scalar_prefetch = 0 : i64, scratch_operands = 1 : i64, tpu.core_type = #tpu.core_type<tc>, window_params = [{transform_indices = @transform_0, window_bounds = array<i64: 4, 8, 32>}, {pipeline_mode = #tpu.pipeline_mode<synchronous>, transform_indices = @transform_1, window_bounds = array<i64: 32, 128>}, {pipeline_mode = #tpu.pipeline_mode<synchronous>, transform_indices = @transform_2, window_bounds = array<i64: 1, 128>}, {transform_indices = @transform_3, window_bounds = array<i64: 4, 128>}]} {
    %c0_i32 = arith.constant 0 : i32
    %0 = arith.cmpi eq, %arg1, %c0_i32 : i32
    %1 = arith.extui %0 : i1 to i32
    %c0_i32_0 = arith.constant 0 : i32
    %2 = arith.cmpi ne, %1, %c0_i32_0 : i32
    scf.if %2 {
      %cst_8 = arith.constant 0xFF800000 : f32
      %11 = vector.broadcast %cst_8 : f32 to vector<4x32xf32>
      %c0_9 = arith.constant 0 : index
      %c0_10 = arith.constant 0 : index
      %12 = vector.load %arg6[%c0_9, %c0_10] : memref<4x32xf32, #tpu.memory_space<vmem>>, vector<4x32xf32>
      tpu.vector_store %arg6[%c0_9, %c0_10], %11 {strides = array<i32>} : memref<4x32xf32, #tpu.memory_space<vmem>>, vector<4x32xf32>,
    } else {
    }
    %c0 = arith.constant 0 : index
    %c0_1 = arith.constant 0 : index
    %c0_2 = arith.constant 0 : index
    %3 = vector.load %arg2[%c0, %c0_1, %c0_2] : memref<4x8x32xf32, #tpu.memory_space<vmem>>, vector<4x8x32xf32>
    %cst = arith.constant dense<0xFF800000> : vector<4x32xf32>
    %4 = vector.multi_reduction <maximumf>, %3, %cst [1] : vector<4x8x32xf32> to vector<4x32xf32>
    %c0_3 = arith.constant 0 : index
    %c0_4 = arith.constant 0 : index
    %5 = vector.load %arg6[%c0_3, %c0_4] : memref<4x32xf32, #tpu.memory_space<vmem>>, vector<4x32xf32>
    %6 = arith.maximumf %5, %4 : vector<4x32xf32>
    %c0_5 = arith.constant 0 : index
    %c0_6 = arith.constant 0 : index
    %7 = vector.load %arg6[%c0_5, %c0_6] : memref<4x32xf32, #tpu.memory_space<vmem>>, vector<4x32xf32>
    tpu.vector_store %arg6[%c0_5, %c0_6], %6 {strides = array<i32>} : memref<4x32xf32, #tpu.memory_space<vmem>>, vector<4x32xf32>,
    %c1_i32 = arith.constant 1 : i32
    %8 = arith.cmpi eq, %arg1, %c1_i32 : i32
    %9 = arith.extui %8 : i1 to i32
    %c0_i32_7 = arith.constant 0 : i32
    %10 = arith.cmpi ne, %9, %c0_i32_7 : i32
    scf.if %10 {
      %c0_8 = arith.constant 0 : index
      %c0_9 = arith.constant 0 : index
      %11 = vector.load %arg6[%c0_8, %c0_9] : memref<4x32xf32, #tpu.memory_space<vmem>>, vector<4x32xf32>
      %c0_10 = arith.constant 0 : index
      %c0_11 = arith.constant 0 : index
      %12 = vector.load %arg3[%c0_10, %c0_11] : memref<32x128xf32, #tpu.memory_space<vmem>>, vector<32x128xf32>
      %cst_12 = arith.constant dense<0.000000e+00> : vector<4x128xf32>
      %13 = tpu.matmul %11, %12, %cst_12 {dimension_numbers = #tpu.dot_dimension_numbers<[1], [0], [0], [1], [0, 0, 1, 1], [], []>} : vector<4x32xf32>, vector<32x128xf32>, vector<4x128xf32> -> vector<4x128xf32>
      %c0_13 = arith.constant 0 : index
      %c0_14 = arith.constant 0 : index
      %14 = vector.load %arg4[%c0_13, %c0_14] : memref<1x128xf32, #tpu.memory_space<vmem>>, vector<1x128xf32>
      %15 = vector.broadcast %14 : vector<1x128xf32> to vector<4x128xf32>
      %16 = arith.addf %13, %15 : vector<4x128xf32>
      %c0_15 = arith.constant 0 : index
      %c0_16 = arith.constant 0 : index
      %17 = vector.load %arg5[%c0_15, %c0_16] : memref<4x128xf32, #tpu.memory_space<vmem>>, vector<4x128xf32>
      tpu.vector_store %arg5[%c0_15, %c0_16], %16 {strides = array<i32>} : memref<4x128xf32, #tpu.memory_space<vmem>>, vector<4x128xf32>,
    } else {
    }
    return
  }
  func.func @transform_0(%arg0: i32, %arg1: i32) -> (i32, i32, i32) {
    %c0_i32 = arith.constant 0 : i32
    %c0_i32_0 = arith.constant 0 : i32
    return %arg0, %arg1, %c0_i32 : i32, i32, i32
  }
  func.func @transform_1(%arg0: i32, %arg1: i32) -> (i32, i32) {
    %c0_i32 = arith.constant 0 : i32
    %c0_i32_0 = arith.constant 0 : i32
    %c0_i32_1 = arith.constant 0 : i32
    return %c0_i32, %c0_i32_0 : i32, i32
  }
  func.func @transform_2(%arg0: i32, %arg1: i32) -> (i32, i32) {
    %c0_i32 = arith.constant 0 : i32
    %c0_i32_0 = arith.constant 0 : i32
    %c0_i32_1 = arith.constant 0 : i32
    return %c0_i32, %c0_i32_0 : i32, i32
  }
  func.func @transform_3(%arg0: i32, %arg1: i32) -> (i32, i32) {
    %c0_i32 = arith.constant 0 : i32
    %c0_i32_0 = arith.constant 0 : i32
    return %arg0, %c0_i32 : i32, i32
  }
}

</mosaic_0001>

<bundles_post_ra>
// kernel: tpu_custom_call.1
= control target key start
LH: loop header
LB: loop body
LE: loop exit
PB: predicated region body
PF: predicated region fallthrough
CT: control target
= control target key end

     0   :  { %8 = vsyncpa [#allocation4], 0  ;;  %s933_s0 = inlined_call_operand.hbm [shape: f32[4,16,32], index: 0, kind: input, shape index: {}]   ;;  %s934_s1 = inlined_call_operand.hbm [shape: f32[32,128], index: 1, kind: input, shape index: {}]   ;;  %s935_s2 = inlined_call_operand.vmem [shape: f32[1,128], index: 2, kind: input, shape index: {}]   ;;  %s936_s3 = inlined_call_operand.hbm [shape: f32[4,128], index: 3, kind: output, shape index: {}]  }
   0x1   :  { %10 = vsyncpa [#allocation4 + $0x1], 0 }
   0x2   :  { %11 = vsyncpa [#allocation7], 0 }
   0x3   :  { %12 = vsyncpa [#allocation5], 0  ;;  %s733_s12 = smov 0   ;;  %s735_s13 = smov 0  }
   0x4   :  { %s737_s14 = smov 0   ;;  %s739_s15 = smov 0  }
   0x5   :  { %s741_s16 = smov 0   ;;  %s743_s17 = smov 0  }
   0x6 LB: > { %s440_s18 = sadd.s32 4294967295, %s701_s17   ;;  %p46_p0 = scmp.ne.s32.totalorder %s689_s14, %s685_s13  ;;  %s701_s17 = sphi %s743_s17, %s18_s17   ;;  %s697_s16 = sphi %s741_s16, %s957_s16   ;;  %s693_s15 = sphi %s739_s15, %s956_s15   ;;  %s689_s14 = sphi %s737_s14, %s955_s14   ;;  %s685_s13 = sphi %s735_s13, %s954_s13   ;;  %s681_s12 = sphi %s733_s12, %s953_s12  }
   0x7   : > { %p47_p1 = scmp.eq.s32.totalorder %s701_s17, 0  ;;  %p52_p2 = scmp.ne.s32.totalorder %s685_s13, %s681_s12 }
   0x8   : > { %p768_p3 = scmp.eq.s32.totalorder %s440_s18, 0  ;;  %p441_p4 = scmp.ge.s32.totalorder %s701_s17, 1 }
   0x9   : > { %p48_p5 = por %p47_p1, %p46_p0  ;;  %p131_p6 = scmp.lt.s32.totalorder %s701_s17, 3 }
   0xa   : > { %s942_s19 = scalar_select %p768_p3, 1, 0 }
   0xb   : > { %p776_p7 = por %p768_p3, %p52_p2  ;;  %p780_p8 = pnand %p441_p4, %p131_p6 }
   0xc   : > { %s703_s22 = smov [#allocation6]   ;;  %p498_p11 = scmp.lt.s32.totalorder %s701_s17, 2 }
   0xd   : > { %s943_s20 = scalar_select %p776_p7, 1, 0 }
   0xe   : > { %s944_s21 = scalar_select %p780_p8, 1, 0 }
   0xf   : > { %s143_s23 = sshll.u32 %s703_s22, 4  ;;  %p489_p9 = pneg %p780_p8  ;;  %s144_s23 = int_to_ptr.vmem [resolvable:$true] %s143_s23 }
  0x10   : > { %s39_s25 = sadd.s32 1, %s689_s14  ;;  %p794_p12 = pnand %p498_p11, %p48_p5 }
  0x11   : > { %p788_p10 = pnand %p489_p9, %p768_p3  ;;  %s559_s29 = scalar_lea.hbm %s934_s1, 512 }
  0x12   : > { %s946_s26 = scalar_select %p794_p12, 1, 0 }
  0x13   : > { %p560_p13 = scmp.ne.s32.totalorder %s934_s1, %s559_s29  ;;  %p561_p0 = pneg %p788_p10 }
  0x14   : > { %p566_p4 = scmp.lt.u32.totalorder %s559_s29, %s934_s1 }
  0x15   : > { %p562_p1 = pnand %p561_p0, %p560_p13 }
  0x17   : > { %p563_p2 = pneg %p562_p1 }
  0x19   : > { %p568_p5 = pnand %p566_p4, %p563_p2 }
  0x1b   : > { %571 = shalt.err (!%p568_p5)
}
  0x1c   : > { %s572_s7 = scalar_lea.vmem %s144_s23, 512  ;;  %p580_p3 = scmp.lt.s32.totalorder %s144_s23, %s144_s23 }
  0x1d   : > { %p573_p6 = scmp.ne.s32.totalorder %s144_s23, %s572_s7  ;;  %p581_p7 = scmp.lt.s32.totalorder %s572_s7, %s572_s7 }
  0x1f   : > { %p575_p9 = pnand %p573_p6, %p561_p0  ;;  %p582_p8 = por %p581_p7, %p580_p3 }
  0x21   : > { %p576_p11 = pneg %p575_p9 }
  0x23   : > { %p583_p12 = pnand %p582_p8, %p576_p11 }
  0x25   : > { %586 = shalt.err (!%p583_p12)
}
  0x26   : > { %s704_s8 = smov 128   ;;  %s705_s9 = smov 8  }
  0x27   : > { %492 = dma.hbm_to_vmem [thread:$0]  (!%p788_p10), %s934_s1, 512, %s144_s23, [#allocation7], %s704_s8, %s704_s8, %s705_s9  }
  0x28   : > { %s27_s12 = sadd.s32 1, %s697_s16  ;;  %s160_s22 = sand.u32 1, %s689_s14  }
  0x29   : > { %p28_p3 = scmp.ge.s32.totalorder %s27_s12, 2  ;;  %s444_s27 = sshll.u32 %s160_s22, 5 }
  0x2a   : > { %s445_s28 = sshll.u32 %s697_s16, 7  ;;  %s164_s23 = scalar_lea.vmem [#allocation3], %s444_s27 }
  0x2b   : > { %s959_s12 = smov (%p28_p3, %s27_s12), 0  ;;  %s825_s24 = scalar_lea.hbm %s933_s0, %s445_s28 }
  0x2c   : > { %s35_s4 = ssub.s32 %s697_s16, %s959_s12  ;;  %s173_s5 = sshll.u32 %s164_s23, 4  ;;  %s829_s5 = int_to_ptr.vmem [resolvable:$true] %s173_s5 }
  0x2d   : > { %p37_p7 = scmp.eq.s32.totalorder %s35_s4, 0  ;;  %s836_s7 = scalar_lea.sflag [#allocation4], %s160_s22 }
  0x2e   : > { %s587_s10 = scalar_lea.hbm %s825_s24, 512  ;;  %p947_p10 = scmp.ne.s32.totalorder %s946_s26, 0 }
  0x2f   : > { %s834_s6 = scalar_select %p37_p7, %s689_s14, %s39_s25  }
  0x30   : > { %p588_p8 = scmp.ne.s32.totalorder %s825_s24, %s587_s10  ;;  %p589_p12 = pneg %p947_p10 }
  0x31   : > { %s592_s27 = scalar_lea.hbm %s933_s0, 1024  ;;  %p593_p1 = scmp.lt.u32.totalorder %s825_s24, %s933_s0 }
  0x32   : > { %p590_p13 = pnand %p589_p12, %p588_p8  ;;  %p594_p2 = scmp.lt.u32.totalorder %s592_s27, %s587_s10 }
  0x33   : > { %p596_p5 = scmp.lt.u32.totalorder %s587_s10, %s825_s24 }
  0x34   : > { %p591_p0 = pneg %p590_p13  ;;  %p595_p4 = por %p594_p2, %p593_p1 }
  0x36   : > { %p597_p6 = por %p596_p5, %p595_p4 }
  0x38   : > { %p598_p9 = pnand %p597_p6, %p591_p0 }
  0x3a   : > { %601 = shalt.err (!%p598_p9)
}
  0x3b   : > { %s602_s25 = scalar_lea.vmem %s829_s5, 512  ;;  %s706_s22 = smov [#allocation3]  }
  0x3c   : > { %p603_p11 = scmp.ne.s32.totalorder %s829_s5, %s602_s25  ;;  %s607_s4 = sshll.u32 %s706_s22, 4  ;;  %s608_s4 = int_to_ptr.vmem [resolvable:$false] %s607_s4 }
  0x3d   : > { %s609_s23 = scalar_lea.vmem %s608_s4, 1024  ;;  %p610_p8 = scmp.lt.s32.totalorder %s829_s5, %s608_s4 }
  0x3e   : > { %p605_p3 = pnand %p603_p11, %p589_p12  ;;  %p611_p13 = scmp.lt.s32.totalorder %s609_s23, %s602_s25 }
  0x40   : > { %p606_p7 = pneg %p605_p3  ;;  %p612_p1 = por %p611_p13, %p610_p8 }
  0x42   : > { %p613_p2 = pnand %p612_p1, %p606_p7 }
  0x44   : > { %616 = shalt.err (!%p613_p2)
}
  0x45   : > { %s707_s10 = smov 256   ;;  %p948_p12 = scmp.ne.s32.totalorder %s944_s21, 0 }
  0x46   : > { %496 = dma.hbm_to_vmem [thread:$0]  (!%p947_p10), %s825_s24, 512, %s829_s5, %s836_s7, %s707_s10, %s704_s8, %s705_s9  }
  0x47   : > { %185 = sbr.rel (%p948_p12) target bundleno = 358 (0x166), region = 32  ;;  %s187_s11 = sand.u32 (!%p948_p12), 1, %s685_s13  }
  0x48   : > { %s447_s28 = sshll.u32 (!%p948_p12), %s187_s11, 5  ;;  %s188_s27 = scalar_lea.sflag (!%p948_p12), [#allocation4], %s187_s11 }
  0x49   : > { %s191_s29 = scalar_lea.vmem (!%p948_p12), [#allocation3], %s447_s28  ;;  %p949_p0 = scmp.ne.s32.totalorder (!%p948_p12), %s943_s20, 0 }
  0x4e   : > { %668 = dma.done.wait (%p949_p0), %s188_s27, 512  }
  0x4f   : > { %670 = vsyncadd (%p949_p0), %s188_s27, 4294966784  ;;  %p950_p4 = scmp.ne.s32.totalorder %s942_s19, 0 }
  0x51   : > { %672 = dma.done.wait (%p950_p4), [#allocation7], 512  }
  0x52   : > { %674 = vsyncadd (%p950_p4), [#allocation7], 4294966784  ;;  %p449_p10 = scmp.ne.s32.totalorder %s693_s15, 0 }
  0x53   : > { %vm218_vm0 = vcmask (!%p449_p10), 257024   ;;  %v708_v0 = vmov (!%p449_p10), -inf  }
  0x54   : > { %217 = sbr.rel (%p449_p10) target bundleno = 91 (0x5b), region = 44  ;;  %219 = vst.msk [vmem:[#allocation2] sm:$0xf] (!%p449_p10), %vm218_vm0, %v708_v0 }
  0x5b PF: > { %v220_v1 = vld [vmem:[%s191_s29] sm:$0xff]  ;;  %v221_v2 = vld [vmem:[%s191_s29 + $0x8] sm:$0xff]  ;;  %v222_v3 = vld [vmem:[%s191_s29 + $0x10] sm:$0xff]  ;;  %vm224_vm1 = vcmask 261120   ;;  %vm258_vm2 = vcmask 1041409   ;;  %vm260_vm3 = vcmask 1042434  }
  0x5c   : > { %v223_v4 = vld [vmem:[%s191_s29 + $0x18] sm:$0xff]  ;;  %v225_v5 = vsel %vm224_vm1, %v220_v1, -inf  ;;  %v232_v6 = vsel %vm224_vm1, %v221_v2, -inf  ;;  %v239_v7 = vsel %vm224_vm1, %v222_v3, -inf  ;;  %vm262_vm4 = vcmask 1043459   ;;  %p450_p5 = scmp.ne.s32.totalorder %s693_s15, 1 }
  0x5d   : > { %v226_v8 = vrot.slane %v225_v5, 4  ;;  %v233_v9 = vrot.slane %v232_v6, 4  ;;  %v240_v10 = vrot.slane %v239_v7, 4  ;;  %v246_v11 = vsel %vm224_vm1, %v223_v4, -inf  ;;  %v253_v33 = vld [vmem:[#allocation2] sm:$0xf] }
  0x5e   : > { %v247_v12 = vrot.slane %v246_v11, 4  ;;  %vm266_vm5 = vcmask 257024   ;;  %v273_v38 = vld [vmem:[#allocation6] sm:$0xff] (!%p450_p5)  ;;  %v274_v39 = vld [vmem:[#allocation6 + $0x8] sm:$0xff] (!%p450_p5)  ;;  %v275_v40 = vld [vmem:[#allocation6 + $0x10] sm:$0xff] (!%p450_p5)  ;;  %v709_v41 = vmov (!%p450_p5), 0.0|0.0  }
  0x5f   : > { %v227_v13 = vmax.f32 %v225_v5, %v226_v8  ;;  %v234_v14 = vmax.f32 %v232_v6, %v233_v9  ;;  %v241_v15 = vmax.f32 %v239_v7, %v240_v10  ;;  %473 = vmatprep.subr.bf16.mxu0 (!%p450_p5), %v709_v41  ;;  %v474_v42 = vpack.c.bf16 (!%p450_p5), %v274_v39, %v273_v38  ;;  %v276_v43 = vld [vmem:[#allocation6 + $0x18] sm:$0xff] (!%p450_p5) }
  0x60   : > { %v248_v16 = vmax.f32 %v246_v11, %v247_v12  ;;  %vm710_vm6 = vmmov (!%p450_p5), 0   ;;  %v711_v44 = vmov (!%p450_p5), 0.0   ;;  %v477_v45 = vpack.c.bf16 (!%p450_p5), %v276_v43, %v275_v40  ;;  %v451_v47 = vld [vmem:[%s935_s2] ss:$0 sm:$0xff] (!%p450_p5) }
  0x61   : > { %v228_v17 = vrot.slane %v227_v13, 2  ;;  %v235_v18 = vrot.slane %v234_v14, 2  ;;  %v242_v19 = vrot.slane %v241_v15, 2  ;;  %470 = vmatprep.mubr.msk.f32.mxu0 (!%p450_p5), %vm710_vm6, %v711_v44  ;;  %475 = vmatpush3.bf16.msra.mxu0 (!%p450_p5), %v474_v42 }
  0x62   : > { %v249_v20 = vrot.slane %v248_v16, 2  ;;  %476 = vmatprep.subr.bf16.mxu0 (!%p450_p5), %v709_v41 }
  0x63   : > { %v229_v21 = vmax.f32 %v227_v13, %v228_v17  ;;  %v236_v22 = vmax.f32 %v234_v14, %v235_v18  ;;  %v243_v23 = vmax.f32 %v241_v15, %v242_v19 }
  0x64   : > { %v250_v24 = vmax.f32 %v248_v16, %v249_v20 }
  0x65   : > { %v230_v25 = vrot.slane %v229_v21, 1  ;;  %v237_v26 = vrot.slane %v236_v22, 1  ;;  %v244_v27 = vrot.slane %v243_v23, 1  ;;  %478 = vmatpush3.bf16.msra.mxu0 (!%p450_p5), %v477_v45 }
  0x66   : > { %v251_v28 = vrot.slane %v250_v24, 1 }
  0x67   : > { %v231_v29 = vmax.f32 %v229_v21, %v230_v25  ;;  %v238_v30 = vmax.f32 %v236_v22, %v237_v26  ;;  %v245_v31 = vmax.f32 %v243_v23, %v244_v27 }
  0x68   : > { %v252_v32 = vmax.f32 %v250_v24, %v251_v28  ;;  %271 = sbr.rel (%p450_p5) target bundleno = 333 (0x14d), region = 48 }
  0x69   : > { %v259_v34 = vsel %vm258_vm2, %v238_v30, %v231_v29 }
  0x6a   : > { %v261_v35 = vsel %vm260_vm3, %v245_v31, %v259_v34 }
  0x6b   : > { %v263_v36 = vsel %vm262_vm4, %v252_v32, %v261_v35 }
  0x6c   : > { %v265_v37 = vmax.f32 %v253_v33, %v263_v36 }
  0x6e   : > { %267 = vst.msk [vmem:[#allocation2] sm:$0xf] %vm266_vm5, %v265_v37 }
  0x75   : > { %v272_v46 = vld [vmem:[#allocation2] sm:$0xf] }
  0x76   : > { %471 = vmatmul.mubr.msk.f32.vlgmr.msra.gmra.mrb[0].mxu0 %vm224_vm1, %v272_v46 }
 0x149   : > { %v353_v48 = vpop.f32.mrb[0].mxu0 }
 0x14a   : > { %v354_v49 = vadd.f32 %v451_v47, %v353_v48  ;;  %v472_v50 = vpop.f32.mrb[1].mxu0 }
 0x14c   : > { %357 = vst [vmem:[#allocation8] sm:$0xf] %v354_v49 }
 0x14d PF: > { %p889_p6 = scmp.eq.s32.totalorder %s440_s18, 1  ;;  %s712_s21 = smov [#allocation8]  }
 0x14e   : > { %s367_s26 = sshll.u32 %s712_s21, 4  ;;  %s368_s26 = int_to_ptr.vmem [resolvable:$true] %s367_s26 }
 0x14f   : > { %s617_s8 = scalar_lea.vmem %s368_s26, 64  ;;  %p624_p7 = scmp.lt.s32.totalorder %s368_s26, %s368_s26 }
 0x150   : > { %p618_p9 = scmp.ne.s32.totalorder %s368_s26, %s617_s8  ;;  %p625_p8 = scmp.lt.s32.totalorder %s617_s8, %s617_s8 }
 0x152   : > { %p619_p11 = pnand %p618_p9, %p889_p6  ;;  %p626_p13 = por %p625_p8, %p624_p7 }
 0x154   : > { %p620_p3 = pneg %p619_p11 }
 0x156   : > { %p627_p1 = pnand %p626_p13, %p620_p3 }
 0x158   : > { %630 = shalt.err (!%p627_p1)
}
 0x159   : > { %s631_s18 = scalar_lea.hbm %s936_s3, 64 }
 0x15a   : > { %p632_p2 = scmp.ne.s32.totalorder %s936_s3, %s631_s18  ;;  %p637_p4 = scmp.lt.u32.totalorder %s631_s18, %s936_s3 }
 0x15c   : > { %p633_p12 = pnand %p632_p2, %p889_p6 }
 0x15e   : > { %p634_p0 = pneg %p633_p12 }
 0x160   : > { %p639_p10 = pnand %p637_p4, %p634_p0 }
 0x162   : > { %642 = shalt.err (!%p639_p10)
}
 0x163   : > { %486 = dma.vmem_to_hbm [thread:$0]  (%p889_p6), %s368_s26, 64, %s936_s3, [#allocation5]  }
 0x164   : > { %676 = dma.done.wait (%p889_p6), [#allocation5], 64  }
 0x165   : > { %678 = vsyncadd (%p889_p6), [#allocation5], 4294967232 }
 0x166 PF: > { %s18_s17 = sadd.s32 1, %s701_s17   ;;  %s952_s23 = smov %s959_s12 }
 0x167   : > { %p15_p5 = scmp.ge.s32.totalorder %s18_s17, 4   ;;  %s953_s12 = smov %s685_s13 }
 0x168   : > { %s954_s13 = smov %s689_s14  ;;  %s955_s14 = smov %s834_s6 }
 0x169   : > { %s956_s15 = smov %s697_s16  ;;  %s957_s16 = smov %s952_s23 }
 0x16a   :  { %17 = sbr.rel (!%p15_p5) target bundleno = 6 (0x6), region = 82 }
 0x171   :  { %380 = vsyncpa [#allocation4], 1 }
 0x172   :  { %382 = vsyncpa [#allocation4 + $0x1], 1 }
 0x173   :  { %383 = vsyncpa [#allocation7], 1 }
 0x174   :  { %384 = vsyncpa [#allocation5], 1 }
 0x175   :  { %386 = vsyncpa [#allocation5 + $0x1], 1 }

</bundles_post_ra>
